<compile_context>
chip_gen: v6e
topology: v6e:2x2x1
jax: 0.10.0
libtpu: 0.0.40
codegen_flags: <defaults>
</compile_context>

<pallas_src>
import functools
import math

import jax
import jax.numpy as jnp
from jax.experimental import pallas as pl
from jax.experimental.pallas import tpu as pltpu

_MIB = 1024 * 1024


# ------------------------------ helpers -------------------------------------


def _tile(dim, target):
    """Largest multiple-of-128 tile <= target dividing dim; else the full dim."""
    if dim <= target:
        return dim
    t = (target // 128) * 128
    while t >= 128:
        if dim % t == 0:
            return t
        t -= 128
    return dim


def _vmem_limit(block_bytes, headroom):
    """Double-buffered block footprint + headroom, clamped to [16 MiB, 64 MiB]."""
    est = 2 * block_bytes + headroom
    return int(min(max(est, 16 * _MIB), 64 * _MIB))


def _apply_activation(y, activation):
    if activation == "gelu":
        # TODO(synk): tanh-approximate GELU (exact-erf GELU differs slightly).
        c = 0.7978845608028654  # sqrt(2/pi)
        return 0.5 * y * (1.0 + jnp.tanh(c * (y + 0.044715 * y * y * y)))
    if activation == "tanh":
        return jnp.tanh(y)
    return y


# ------------------------- tiled dense (bias + act) --------------------------


def _dense_kernel(x_ref, w_ref, b_ref, o_ref, *, activation):
    # Single K step: no accumulator scratch, result goes straight to the output.
    y = jnp.dot(x_ref[...], w_ref[...], preferred_element_type=jnp.float32)
    y = _apply_activation(y + b_ref[...], activation)
    o_ref[...] = y.astype(o_ref.dtype)


def _dense_kernel_acc(x_ref, w_ref, b_ref, o_ref, acc_ref, *, activation):
    @pl.when(pl.program_id(2) == 0)
    def _():
        acc_ref[...] = jnp.zeros_like(acc_ref)

    acc_ref[...] += jnp.dot(x_ref[...], w_ref[...],
                            preferred_element_type=jnp.float32)

    @pl.when(pl.program_id(2) == pl.num_programs(2) - 1)
    def _():
        y = _apply_activation(acc_ref[...] + b_ref[...], activation)
        o_ref[...] = y.astype(o_ref.dtype)


def dense(x, w, b, activation="none", out_dtype=jnp.bfloat16,
          tm=512, tn=3072, tk_max=4096):
    M, K = x.shape
    _, N = w.shape
    tm = _tile(M, tm)
    tn = _tile(N, tn)                 # N untiled whenever it fits the target
    tk = K if K <= tk_max else _tile(K, tk_max)
    gm, gn, gk = M // tm, N // tn, K // tk
    xb = jnp.dtype(x.dtype).itemsize
    wb = jnp.dtype(w.dtype).itemsize
    ob = jnp.dtype(out_dtype).itemsize
    block_bytes = tm * tk * xb + tk * tn * wb + tn * 4 + tm * tn * ob
    headroom = 2 * tm * tn * 4 + 8 * _MIB          # f32 intermediates of the epilogue
    cost = pl.CostEstimate(
        flops=int(2 * M * N * K),
        transcendentals=int(M * N) if activation in ("gelu", "tanh") else 0,
        bytes_accessed=int(gn * M * K * xb + K * N * wb + N * 4 + M * N * ob))

    if gk == 1:
        # Grid ordered (N-tiles, M-tiles): M varies fastest so the weight block index
        # is constant across the sweep -> weights are streamed from HBM only once.
        return pl.pallas_call(
            functools.partial(_dense_kernel, activation=activation),
            out_shape=jax.ShapeDtypeStruct((M, N), out_dtype),
            grid=(gn, gm),
            in_specs=[
                pl.BlockSpec((tm, K), lambda j, i: (i, 0)),
                pl.BlockSpec((K, tn), lambda j, i: (0, j)),
                pl.BlockSpec((1, tn), lambda j, i: (0, j)),
            ],
            out_specs=pl.BlockSpec((tm, tn), lambda j, i: (i, j)),
            compiler_params=pltpu.CompilerParams(
                dimension_semantics=("parallel", "parallel"),
                vmem_limit_bytes=_vmem_limit(block_bytes, headroom)),
            cost_estimate=cost,
        )(x, w, b)

    # Fallback for very large K: split K on an "arbitrary" axis with an f32 accumulator.
    return pl.pallas_call(
        functools.partial(_dense_kernel_acc, activation=activation),
        out_shape=jax.ShapeDtypeStruct((M, N), out_dtype),
        grid=(gn, gm, gk),
        in_specs=[
            pl.BlockSpec((tm, tk), lambda j, i, k: (i, k)),
            pl.BlockSpec((tk, tn), lambda j, i, k: (k, j)),
            pl.BlockSpec((1, tn), lambda j, i, k: (0, j)),
        ],
        out_specs=pl.BlockSpec((tm, tn), lambda j, i, k: (i, j)),
        scratch_shapes=[pltpu.VMEM((tm, tn), jnp.float32)],
        compiler_params=pltpu.CompilerParams(
            dimension_semantics=("parallel", "parallel", "arbitrary"),
            vmem_limit_bytes=_vmem_limit(block_bytes + tm * tn * 4, headroom)),
        cost_estimate=cost,
    )(x, w, b)


# -------------- tiled dense + bias + residual-add + LayerNorm ----------------


def _dense_res_ln_kernel(x_ref, w_ref, b_ref, r_ref, g_ref, be_ref, o_ref, *, eps):
    y = jnp.dot(x_ref[...], w_ref[...], preferred_element_type=jnp.float32)
    y = y + b_ref[...] + r_ref[...].astype(jnp.float32)
    mean = jnp.mean(y, axis=-1, keepdims=True)
    var = jnp.mean((y - mean) * (y - mean), axis=-1, keepdims=True)
    yn = (y - mean) * jax.lax.rsqrt(var + eps)
    o_ref[...] = (yn * g_ref[...] + be_ref[...]).astype(o_ref.dtype)


def _dense_res_ln_kernel_acc(x_ref, w_ref, b_ref, r_ref, g_ref, be_ref,
                             o_ref, acc_ref, *, eps):
    @pl.when(pl.program_id(1) == 0)
    def _():
        acc_ref[...] = jnp.zeros_like(acc_ref)

    acc_ref[...] += jnp.dot(x_ref[...], w_ref[...],
                            preferred_element_type=jnp.float32)

    @pl.when(pl.program_id(1) == pl.num_programs(1) - 1)
    def _():
        y = acc_ref[...] + b_ref[...] + r_ref[...].astype(jnp.float32)
        mean = jnp.mean(y, axis=-1, keepdims=True)
        var = jnp.mean((y - mean) * (y - mean), axis=-1, keepdims=True)
        yn = (y - mean) * jax.lax.rsqrt(var + eps)
        o_ref[...] = (yn * g_ref[...] + be_ref[...]).astype(o_ref.dtype)


def dense_residual_layernorm(x, w, b, residual, gamma, beta, eps=1e-12,
                             out_dtype=jnp.bfloat16, tm=512, tk_max=4096):
    M, K = x.shape
    _, N = w.shape                     # N (=E) stays untiled so LN runs in-kernel
    tm = _tile(M, tm)
    tk = K if K <= tk_max else _tile(K, tk_max)
    gm, gk = M // tm, K // tk
    xb = jnp.dtype(x.dtype).itemsize
    wb = jnp.dtype(w.dtype).itemsize
    ob = jnp.dtype(out_dtype).itemsize
    rb = jnp.dtype(residual.dtype).itemsize
    block_bytes = tm * tk * xb + tk * N * wb + tm * N * (rb + ob) + 3 * N * 4
    headroom = 2 * tm * N * 4 + 8 * _MIB
    cost = pl.CostEstimate(
        flops=int(2 * M * N * K + 8 * M * N),
        transcendentals=int(M),
        bytes_accessed=int(M * K * xb + K * N * wb + M * N * (rb + ob) + 12 * N))

    if gk == 1:
        return pl.pallas_call(
            functools.partial(_dense_res_ln_kernel, eps=eps),
            out_shape=jax.ShapeDtypeStruct((M, N), out_dtype),
            grid=(gm,),
            in_specs=[
                pl.BlockSpec((tm, K), lambda i: (i, 0)),
                pl.BlockSpec((K, N), lambda i: (0, 0)),   # weight block stays resident
                pl.BlockSpec((1, N), lambda i: (0, 0)),
                pl.BlockSpec((tm, N), lambda i: (i, 0)),
                pl.BlockSpec((1, N), lambda i: (0, 0)),
                pl.BlockSpec((1, N), lambda i: (0, 0)),
            ],
            out_specs=pl.BlockSpec((tm, N), lambda i: (i, 0)),
            compiler_params=pltpu.CompilerParams(
                dimension_semantics=("parallel",),
                vmem_limit_bytes=_vmem_limit(block_bytes, headroom)),
            cost_estimate=cost,
        )(x, w, b, residual, gamma, beta)

    return pl.pallas_call(
        functools.partial(_dense_res_ln_kernel_acc, eps=eps),
        out_shape=jax.ShapeDtypeStruct((M, N), out_dtype),
        grid=(gm, gk),
        in_specs=[
            pl.BlockSpec((tm, tk), lambda i, k: (i, k)),
            pl.BlockSpec((tk, N), lambda i, k: (k, 0)),
            pl.BlockSpec((1, N), lambda i, k: (0, 0)),
            pl.BlockSpec((tm, N), lambda i, k: (i, 0)),
            pl.BlockSpec((1, N), lambda i, k: (0, 0)),
            pl.BlockSpec((1, N), lambda i, k: (0, 0)),
        ],
        out_specs=pl.BlockSpec((tm, N), lambda i, k: (i, 0)),
        scratch_shapes=[pltpu.VMEM((tm, N), jnp.float32)],
        compiler_params=pltpu.CompilerParams(
            dimension_semantics=("parallel", "arbitrary"),
            vmem_limit_bytes=_vmem_limit(block_bytes + tm * N * 4, headroom)),
        cost_estimate=cost,
    )(x, w, b, residual, gamma, beta)


# ---------------------- row-tiled LayerNorm (no residual) --------------------


def _ln_kernel(x_ref, g_ref, b_ref, o_ref, *, eps):
    x = x_ref[...].astype(jnp.float32)
    mean = jnp.mean(x, axis=-1, keepdims=True)
    var = jnp.mean((x - mean) * (x - mean), axis=-1, keepdims=True)
    yn = (x - mean) * jax.lax.rsqrt(var + eps)
    o_ref[...] = (yn * g_ref[...] + b_ref[...]).astype(o_ref.dtype)


def layernorm(x, gamma, beta, eps=1e-12, out_dtype=jnp.bfloat16, tm=512):
    M, H = x.shape
    tm = _tile(M, tm)
    return pl.pallas_call(
        functools.partial(_ln_kernel, eps=eps),
        out_shape=jax.ShapeDtypeStruct((M, H), out_dtype),
        grid=(M // tm,),
        in_specs=[
            pl.BlockSpec((tm, H), lambda i: (i, 0)),
            pl.BlockSpec((1, H), lambda i: (0, 0)),
            pl.BlockSpec((1, H), lambda i: (0, 0)),
        ],
        out_specs=pl.BlockSpec((tm, H), lambda i: (i, 0)),
        compiler_params=pltpu.CompilerParams(dimension_semantics=("parallel",)),
    )(x, gamma, beta)


# ------------- masked attention straight off the (B, S, 3E) layout -----------


def _attn_kernel(qkv_ref, m_ref, o_ref, *, num_heads, head_dim):
    # qkv_ref block: (1, S, 3E) bf16 -- QKV dense output, heads in dense layout.
    # m_ref block:   (1, 1, S) f32 additive mask, shared across heads / query rows.
    E = num_heads * head_dim
    qkv = qkv_ref[0]                    # (S, 3E); 1/sqrt(Dh) already folded into Wq
    mask = m_ref[0]                     # (1, S)
    outs = []
    for h in range(num_heads):          # statically unrolled per-head loop
        lo = h * head_dim
        q = qkv[:, lo:lo + head_dim]                     # (S, Dh)
        k = qkv[:, E + lo:E + lo + head_dim]             # (S, Dh)
        v = qkv[:, 2 * E + lo:2 * E + lo + head_dim]     # (S, Dh)
        s = jax.lax.dot_general(q, k, (((1,), (1,)), ((), ())),
                                preferred_element_type=jnp.float32)   # (S, S)
        s = s + mask
        s = s - jnp.max(s, axis=-1, keepdims=True)
        p = jnp.exp(s.astype(jnp.bfloat16))              # bf16 exp (EUP bf16 path)
        l = jnp.sum(p.astype(jnp.float32), axis=-1, keepdims=True)    # (S, 1) f32
        o = jnp.dot(p, v, preferred_element_type=jnp.float32)         # (S, Dh)
        o = o * pl.reciprocal(l, approx=True)
        outs.append(o.astype(o_ref.dtype))
    # Heads merged in VMEM -> one lane-dense (S, E) store, already in BERT layout.
    o_ref[0] = jnp.concatenate(outs, axis=-1)


def attention(qkv, mask, num_heads):
    # qkv: (B, S, 3E) bf16    mask: (B, 1, S) f32 additive
    B, S, threeE = qkv.shape
    E = threeE // 3
    head_dim = E // num_heads
    block_bytes = S * threeE * 2 + S * 4 + S * E * 2
    # per-head (S,S) scores/probs + merged output, plus slack
    headroom = 8 * S * S + 6 * S * E + 8 * _MIB
    return pl.pallas_call(
        functools.partial(_attn_kernel, num_heads=num_heads, head_dim=head_dim),
        out_shape=jax.ShapeDtypeStruct((B, S, E), jnp.bfloat16),
        grid=(B,),
        in_specs=[
            pl.BlockSpec((1, S, threeE), lambda b: (b, 0, 0)),
            pl.BlockSpec((1, 1, S), lambda b: (b, 0, 0)),
        ],
        out_specs=pl.BlockSpec((1, S, E), lambda b: (b, 0, 0)),
        compiler_params=pltpu.CompilerParams(
            dimension_semantics=("parallel",),
            vmem_limit_bytes=_vmem_limit(block_bytes, headroom)),
        cost_estimate=pl.CostEstimate(
            flops=int(4 * B * num_heads * S * S * head_dim),
            transcendentals=int(B * num_heads * S * S),
            bytes_accessed=int(qkv.size * 2 + mask.size * 4 + B * S * E * 2)),
    )(qkv, mask)


# ----------------------------- parameter setup ------------------------------


def init_params(key, embed_size, word_vocab, type_vocab, pos_vocab,
                num_layers, num_heads):
    E = embed_size
    I = 4 * E
    Dh = E // num_heads
    q_scale = 1.0 / math.sqrt(Dh)
    keys = jax.random.split(key, 4 + num_layers)

    def normal(k, shape):
        return (0.02 * jax.random.normal(k, shape)).astype(jnp.float32)

    def w16(k, shape):
        return normal(k, shape).astype(jnp.bfloat16)   # MXU operands stay bf16

    params = {
        "num_heads": num_heads,
        "word_emb": normal(keys[0], (word_vocab, E)),
        "type_emb": normal(keys[1], (type_vocab, E)),
        "pos_emb": normal(keys[2], (pos_vocab, E)),
        "emb_ln_g": jnp.ones((1, E), jnp.float32),
        "emb_ln_b": jnp.zeros((1, E), jnp.float32),
        "pool_w": w16(keys[3], (E, E)),
        "pool_b": jnp.zeros((1, E), jnp.float32),
        "layers": [],
    }
    for l in range(num_layers):
        lk = jax.random.split(keys[4 + l], 6)
        # Fused QKV projection (E, 3E); 1/sqrt(Dh) folded into the Q third of W and b
        # so the attention kernel never rescales q at runtime.
        w_qkv = jnp.concatenate(
            [normal(lk[0], (E, E)) * q_scale,
             normal(lk[1], (E, E)),
             normal(lk[2], (E, E))], axis=1).astype(jnp.bfloat16)
        b_qkv = jnp.concatenate(
            [jnp.zeros((1, E), jnp.float32) * q_scale,
             jnp.zeros((1, E), jnp.float32),
             jnp.zeros((1, E), jnp.float32)], axis=1)
        params["layers"].append({
            "w_qkv": w_qkv, "b_qkv": b_qkv,
            "wo": w16(lk[3], (E, E)), "bo": jnp.zeros((1, E), jnp.float32),
            "ln1_g": jnp.ones((1, E), jnp.float32),
            "ln1_b": jnp.zeros((1, E), jnp.float32),
            "wi": w16(lk[4], (E, I)), "bi": jnp.zeros((1, I), jnp.float32),
            "wo2": w16(lk[5], (I, E)), "bo2": jnp.zeros((1, E), jnp.float32),
            "ln2_g": jnp.ones((1, E), jnp.float32),
            "ln2_b": jnp.zeros((1, E), jnp.float32),
        })
    return params


# ------------------------------- forward pass -------------------------------


def bert_forward(params, input_ids, token_ids, mask_ids=None):
    B, S = input_ids.shape
    E = params["word_emb"].shape[1]
    NH = params["num_heads"]

    # --- Embed: word + token-type + position embeddings -> LayerNorm (bf16 out) ---
    # (table gathers kept in plain JAX; dropout is an eval-mode no-op)
    pos_ids = jnp.arange(S)
    emb = (jnp.take(params["word_emb"], input_ids, axis=0)
           + jnp.take(params["type_emb"], token_ids, axis=0)
           + jnp.take(params["pos_emb"], pos_ids, axis=0)[None, :, :])
    # cast to bf16 before the mem-bound LN kernel; LN stats are computed in f32 inside
    x = layernorm(emb.astype(jnp.bfloat16).reshape(B * S, E),
                  params["emb_ln_g"], params["emb_ln_b"])

    # --- additive attention mask, one copy per batch row (shared across heads) ---
    if mask_ids is None:
        add_mask = jnp.zeros((B, 1, S), jnp.float32)
    else:
        add_mask = ((1.0 - mask_ids.astype(jnp.float32)) * -10000.0)[:, None, :]

    # --- BertEncoder: num_layers transformer layers ---
    for layer in params["layers"]:
        # fused Q/K/V projection -> (B, S, 3E); only a free reshape, no transposes
        qkv = dense(x, layer["w_qkv"], layer["b_qkv"]).reshape(B, S, 3 * E)
        # attention reads q/k/v as column slices and writes heads already merged
        ctx = attention(qkv, add_mask, NH).reshape(B * S, E)
        # attention output projection + residual + LayerNorm, fused
        x = dense_residual_layernorm(ctx, layer["wo"], layer["bo"], x,
                                     layer["ln1_g"], layer["ln1_b"])
        # FFN up-projection with fused GELU
        h = dense(x, layer["wi"], layer["bi"], activation="gelu")
        # FFN down-projection + residual + LayerNorm, fused
        x = dense_residual_layernorm(h, layer["wo2"], layer["bo2"], x,
                                     layer["ln2_g"], layer["ln2_b"])

    # --- BertCLSCondenser: take [CLS] token, Linear(E, E) + tanh pooler ---
    cls = x.reshape(B, S, E)[:, 0, :]
    pooled = dense(cls, params["pool_w"], params["pool_b"],
                   activation="tanh", out_dtype=jnp.float32)
    return pooled


# ---------------------------------- main -------------------------------------


if __name__ == "__main__":
    B, S = 2, 8
    embed_size = 32
    num_heads = 4
    num_layers = 2
    word_vocab_size, type_vocab_size, position_vocab_size = 64, 2, 16

    root = jax.random.PRNGKey(0)
    kp, k1, k2 = jax.random.split(root, 3)

    params = init_params(kp, embed_size, word_vocab_size, type_vocab_size,
                         position_vocab_size, num_layers, num_heads)

    input_ids = jax.random.randint(k1, (B, S), 0, word_vocab_size, dtype=jnp.int32)
    token_ids = jax.random.randint(k2, (B, S), 0, type_vocab_size, dtype=jnp.int32)
    mask_ids = jnp.ones((B, S), jnp.int32)

    out = bert_forward(params, input_ids, token_ids, mask_ids)
    jax.block_until_ready(out)
    assert out.shape == (B, embed_size)
    print("KERNEL_OK")
</pallas_src>

<mosaic_0001>
module attributes {stable_mosaic.version = 11 : i64} {
  func.func @_ln_kernel(%arg0: i32, %arg1: memref<16x32xbf16, #tpu.memory_space<vmem>>, %arg2: memref<1x32xf32, #tpu.memory_space<vmem>>, %arg3: memref<1x32xf32, #tpu.memory_space<vmem>>, %arg4: memref<16x32xbf16, #tpu.memory_space<vmem>>) attributes {dimension_semantics = [#tpu.dimension_semantics<parallel>], iteration_bounds = array<i64: 1>, scalar_prefetch = 0 : i64, scratch_operands = 0 : i64, tpu.core_type = #tpu.core_type<tc>, window_params = [{transform_indices = @transform_0, window_bounds = array<i64: 16, 32>}, {pipeline_mode = #tpu.pipeline_mode<synchronous>, transform_indices = @transform_1, window_bounds = array<i64: 1, 32>}, {pipeline_mode = #tpu.pipeline_mode<synchronous>, transform_indices = @transform_2, window_bounds = array<i64: 1, 32>}, {transform_indices = @transform_3, window_bounds = array<i64: 16, 32>}]} {
    %c0 = arith.constant 0 : index
    %c0_0 = arith.constant 0 : index
    %0 = vector.load %arg1[%c0, %c0_0] : memref<16x32xbf16, #tpu.memory_space<vmem>>, vector<16x32xbf16>
    %1 = arith.extf %0 : vector<16x32xbf16> to vector<16x32xf32>
    %cst = arith.constant dense<0.000000e+00> : vector<16xf32>
    %2 = vector.multi_reduction <add>, %1, %cst [1] : vector<16x32xf32> to vector<16xf32>
    %3 = vector.shape_cast %2 : vector<16xf32> to vector<16x1xf32>
    %cst_1 = arith.constant 3.200000e+01 : f32
    %4 = vector.broadcast %cst_1 : f32 to vector<16x1xf32>
    %5 = arith.divf %3, %4 : vector<16x1xf32>
    %6 = vector.broadcast %5 : vector<16x1xf32> to vector<16x32xf32>
    %7 = arith.subf %1, %6 : vector<16x32xf32>
    %8 = vector.broadcast %5 : vector<16x1xf32> to vector<16x32xf32>
    %9 = arith.subf %1, %8 : vector<16x32xf32>
    %10 = arith.mulf %7, %9 : vector<16x32xf32>
    %cst_2 = arith.constant dense<0.000000e+00> : vector<16xf32>
    %11 = vector.multi_reduction <add>, %10, %cst_2 [1] : vector<16x32xf32> to vector<16xf32>
    %12 = vector.shape_cast %11 : vector<16xf32> to vector<16x1xf32>
    %cst_3 = arith.constant 3.200000e+01 : f32
    %13 = vector.broadcast %cst_3 : f32 to vector<16x1xf32>
    %14 = arith.divf %12, %13 : vector<16x1xf32>
    %15 = vector.broadcast %5 : vector<16x1xf32> to vector<16x32xf32>
    %16 = arith.subf %1, %15 : vector<16x32xf32>
    %cst_4 = arith.constant 9.99999996E-13 : f32
    %17 = vector.broadcast %cst_4 : f32 to vector<16x1xf32>
    %18 = arith.addf %14, %17 : vector<16x1xf32>
    %19 = math.rsqrt %18 : vector<16x1xf32>
    %20 = vector.broadcast %19 : vector<16x1xf32> to vector<16x32xf32>
    %21 = arith.mulf %16, %20 : vector<16x32xf32>
    %c0_5 = arith.constant 0 : index
    %c0_6 = arith.constant 0 : index
    %22 = vector.load %arg2[%c0_5, %c0_6] : memref<1x32xf32, #tpu.memory_space<vmem>>, vector<1x32xf32>
    %23 = vector.broadcast %22 : vector<1x32xf32> to vector<16x32xf32>
    %24 = arith.mulf %21, %23 : vector<16x32xf32>
    %c0_7 = arith.constant 0 : index
    %c0_8 = arith.constant 0 : index
    %25 = vector.load %arg3[%c0_7, %c0_8] : memref<1x32xf32, #tpu.memory_space<vmem>>, vector<1x32xf32>
    %26 = vector.broadcast %25 : vector<1x32xf32> to vector<16x32xf32>
    %27 = arith.addf %24, %26 : vector<16x32xf32>
    %28 = arith.truncf %27 : vector<16x32xf32> to vector<16x32xbf16>
    %c0_9 = arith.constant 0 : index
    %c0_10 = arith.constant 0 : index
    %29 = vector.load %arg4[%c0_9, %c0_10] : memref<16x32xbf16, #tpu.memory_space<vmem>>, vector<16x32xbf16>
    tpu.vector_store %arg4[%c0_9, %c0_10], %28 {strides = array<i32>} : memref<16x32xbf16, #tpu.memory_space<vmem>>, vector<16x32xbf16>,
    return
  }
  func.func @transform_0(%arg0: i32) -> (i32, i32) {
    %c0_i32 = arith.constant 0 : i32
    %c0_i32_0 = arith.constant 0 : i32
    return %arg0, %c0_i32 : i32, i32
  }
  func.func @transform_1(%arg0: i32) -> (i32, i32) {
    %c0_i32 = arith.constant 0 : i32
    %c0_i32_0 = arith.constant 0 : i32
    %c0_i32_1 = arith.constant 0 : i32
    return %c0_i32, %c0_i32_0 : i32, i32
  }
  func.func @transform_2(%arg0: i32) -> (i32, i32) {
    %c0_i32 = arith.constant 0 : i32
    %c0_i32_0 = arith.constant 0 : i32
    %c0_i32_1 = arith.constant 0 : i32
    return %c0_i32, %c0_i32_0 : i32, i32
  }
  func.func @transform_3(%arg0: i32) -> (i32, i32) {
    %c0_i32 = arith.constant 0 : i32
    %c0_i32_0 = arith.constant 0 : i32
    return %arg0, %c0_i32 : i32, i32
  }
}

</mosaic_0001>

<bundles_post_ra>
// kernel: tpu_custom_call.1
= control target key start
LH: loop header
LB: loop body
LE: loop exit
PB: predicated region body
PF: predicated region fallthrough
CT: control target
= control target key end

     0   :  { %8 = vsyncpa [#allocation3], 0  ;;  %s215_s0 = inlined_call_operand.hbm [shape: bf16[16,32], index: 0, kind: input, shape index: {}]   ;;  %s216_s1 = inlined_call_operand.vmem [shape: f32[1,32], index: 1, kind: input, shape index: {}]   ;;  %s217_s2 = inlined_call_operand.vmem [shape: f32[1,32], index: 2, kind: input, shape index: {}]   ;;  %s218_s3 = inlined_call_operand.hbm [shape: bf16[16,32], index: 3, kind: output, shape index: {}]  }
   0x1   :  { %9 = vsyncpa [#allocation4], 0  ;;  %s169_s12 = smov [#allocation2]  }
   0x2   :  { %s15_s13 = sshll.u32 %s169_s12, 4  ;;  %s16_s13 = int_to_ptr.vmem [resolvable:$true] %s15_s13 }
   0x3   :  { %s133_s14 = scalar_lea.vmem %s16_s13, 128  ;;  %p138_p1 = scmp.lt.s32.totalorder %s16_s13, %s16_s13 }
   0x4   :  { %p134_p0 = scmp.ne.s32.totalorder %s16_s13, %s133_s14  ;;  %p139_p2 = scmp.lt.s32.totalorder %s133_s14, %s133_s14 }
   0x6   :  { %p140_p3 = por %p139_p2, %p138_p1 }
   0x8   :  { %p141_p4 = pnand %p140_p3, %p134_p0 }
   0xa   :  { %144 = shalt.err (!%p141_p4)
}
   0xb   :  { %s170_s15 = smov 64   ;;  %s171_s16 = smov 4  }
   0xc   :  { %21 = dma.hbm_to_vmem [thread:$0]  %s215_s0, 128, %s16_s13, [#allocation3], %s170_s15, %s170_s15, %s171_s16  }
   0xd   :  { %165 = dma.done.wait [#allocation3], 128  }
   0xe   :  { %166 = vsyncadd [#allocation3], 4294967168  ;;  %v114_v0 = vld [vmem:[#allocation2] sm:$0xff]   ;;  %vm33_vm0 = vcmask 261120   ;;  %vm87_vm1 = vcmask 257024   ;;  %s172_s22 = smov [#allocation5]  }
   0xf   :  { %v115_v1 = vunpack.c.l.bf16 %v114_v0  ;;  %v116_v2 = vunpack.c.h.bf16 %v114_v0  ;;  %v107_v22 = vld [vmem:[%s216_s1] ss:$0 sm:$0xff]  ;;  %s95_s23 = sshll.u32 %s172_s22, 4  ;;  %s96_s23 = int_to_ptr.vmem [resolvable:$true] %s95_s23 }
  0x10   :  { %v108_v24 = vld [vmem:[%s217_s2] ss:$0 sm:$0xff]  ;;  %s145_s1 = scalar_lea.vmem %s96_s23, 128  ;;  %p150_p6 = scmp.lt.s32.totalorder %s96_s23, %s96_s23 }
  0x11   :  { %v34_v3 = vsel %vm33_vm0, %v115_v1, 0.0  ;;  %v37_v4 = vsel %vm33_vm0, %v116_v2, 0.0  ;;  %p146_p5 = scmp.ne.s32.totalorder %s96_s23, %s145_s1  ;;  %p151_p7 = scmp.lt.s32.totalorder %s145_s1, %s145_s1 }
  0x12   :  { %35 = vadd.xlane.f32.xlu0 %v34_v3 }
  0x13   :  { %p152_p8 = por %p151_p7, %p150_p6 }
  0x15   :  { %p153_p9 = pnand %p152_p8, %p146_p5 }
  0x16   :  { %38 = vadd.xlane.f32.xlu0 %v37_v4 }
  0x9b   :  { %v36_v5 = vpop.xlane.xlu0 %35 }
  0x9c   :  { %v41_v6 = vmul.f32 0.03125, %v36_v5 }
  0x9e   :  { %v43_v7 = vsub.f32 %v115_v1, %v41_v6 }
  0x9f   :  { %v39_v8 = vpop.xlane.xlu0 %38 }
  0xa0   :  { %v42_v9 = vmul.f32 0.03125, %v39_v8  ;;  %v45_v10 = vmul.f32 %v43_v7, %v43_v7 }
  0xa2   :  { %v44_v11 = vsub.f32 %v116_v2, %v42_v9  ;;  %v47_v12 = vsel %vm33_vm0, %v45_v10, 0.0 }
  0xa3   :  { %48 = vadd.xlane.f32.xlu1 %v47_v12 }
  0xa4   :  { %v46_v13 = vmul.f32 %v44_v11, %v44_v11 }
  0xa6   :  { %v50_v14 = vsel %vm33_vm0, %v46_v13, 0.0 }
  0xa7   :  { %51 = vadd.xlane.f32.xlu1 %v50_v14 }
 0x12c   :  { %v49_v15 = vpop.xlane.xlu1 %48 }
 0x12d   :  { %v53_v16 = vmul.f32 0.03125, %v49_v15 }
 0x12f   :  { %v55_v17 = vadd.f32 1e-12, %v53_v16 }
 0x130   :  { %v52_v18 = vpop.xlane.xlu1 %51 }
 0x131   :  { %121 = vrsqrt.f32 %v55_v17  ;;  %v54_v19 = vmul.f32 0.03125, %v52_v18 }
 0x133   :  { %v56_v20 = vadd.f32 1e-12, %v54_v19 }
 0x135   :  { %123 = vrsqrt.f32 %v56_v20 }
 0x13e   :  { %v122_v21 = vpop.eup %121 }
 0x13f   :  { %v59_v23 = vmul.f32 %v122_v21, %v43_v7 }
 0x141   :  { %v68_v25 = vmul.f32 %v107_v22, %v59_v23 }
 0x142   :  { %v124_v26 = vpop.eup %123 }
 0x143   :  { %v60_v27 = vmul.f32 %v124_v26, %v44_v11  ;;  %v77_v28 = vadd.f32 %v108_v24, %v68_v25 }
 0x145   :  { %v69_v29 = vmul.f32 %v107_v22, %v60_v27  ;;  %v111_v30 = vpack.c.bf16 %v77_v28, %v77_v28 }
 0x147   :  { %v78_v31 = vadd.f32 %v108_v24, %v69_v29  ;;  %88 = vst.msk [vmem:[#allocation5] sm:$0xf] %vm87_vm1, %v111_v30 }
 0x149   :  { %v112_v32 = vpack.c.bf16 %v78_v31, %v78_v31 }
 0x14b   :  { %89 = vst.msk [vmem:[#allocation5 + $0x4] sm:$0xf] %vm87_vm1, %v112_v32 }
 0x14c   :  { %156 = shalt.err (!%p153_p9)
}
 0x14d   :  { %101 = dma.vmem_to_hbm [thread:$0]  %s96_s23, 128, %s218_s3, [#allocation4], %s170_s15, %s170_s15, %s171_s16  }
 0x14e   :  { %167 = dma.done.wait [#allocation4], 128  }
 0x14f   :  { %168 = vsyncadd [#allocation4], 4294967168 }
 0x150   :  { %105 = vsyncpa [#allocation3], 1 }
 0x151   :  { %106 = vsyncpa [#allocation4], 1 }

</bundles_post_ra>
